<compile_context>
chip_gen: v6e
topology: v6e:2x2x1
jax: 0.10.0
libtpu: 0.0.40
codegen_flags: <defaults>
</compile_context>

<pallas_src>
import functools

import jax
import jax.numpy as jnp
from jax.experimental import pallas as pl
from jax.experimental.pallas import tpu as pltpu


# ---------------------------------------------------------------------------
# Kernel
# ---------------------------------------------------------------------------
def _ce_tile_kernel(logits_ref, targets_ref, out_ref, acc_ref, *,
                    total_n, tile_n, tiles_per_shard, bf16_compute):
    """Accumulate per-shard sum of per-row NLL over (tile_n, C) logit tiles.

    Grid = (num_row_shards "parallel", tiles_per_shard "arbitrary").
    acc_ref is a (1,1) f32 VMEM scratch holding the running NLL sum for the
    current shard; it is zeroed at the shard's first tile and flushed to the
    shard's output row at its last tile.  The mean (divide by the true total
    N) and the cross-shard sum happen in the wrapper.
    """
    shard = pl.program_id(0)
    step = pl.program_id(1)

    @pl.when(step == 0)
    def _():
        acc_ref[...] = jnp.zeros_like(acc_ref)

    x = logits_ref[...]                               # (tile_n, C) native dtype
    t = targets_ref[...]                              # (tile_n, 1) int32
    c = x.shape[-1]

    # ---- target-logit gather on the NATIVE dtype tile (one-hot compare) ----
    col = jax.lax.broadcasted_iota(jnp.int32, (1, c), 1)        # (1, C)
    hit = col == t                                              # (tile_n, C) via broadcast
    x_t = jnp.sum(jnp.where(hit, x, jnp.zeros((), dtype=x.dtype)),
                  axis=-1, keepdims=True).astype(jnp.float32)   # (tile_n, 1)

    # ---- numerically-stable logsumexp per row ----
    if bf16_compute and x.dtype == jnp.bfloat16:
        xc = x                                        # bf16 VPU/EUP fast path
    else:
        xc = x.astype(jnp.float32)
    m = jnp.max(xc, axis=-1, keepdims=True)           # (tile_n, 1)
    e = jnp.exp(xc - m)                               # (tile_n, C)
    se = jnp.sum(e.astype(jnp.float32), axis=-1, keepdims=True)  # f32 accumulate
    lse = m.astype(jnp.float32) + jnp.log(se)         # (tile_n, 1) f32

    nll = lse - x_t                                   # (tile_n, 1)

    # mask rows beyond the true N (padded final tile / out-of-range shard tiles)
    tile_idx = shard * tiles_per_shard + step
    row = jax.lax.broadcasted_iota(jnp.int32, nll.shape, 0) + tile_idx * tile_n
    nll = jnp.where(row < total_n, nll, 0.0)

    acc_ref[...] += jnp.sum(nll, keepdims=True)       # (1,1)

    @pl.when(step == tiles_per_shard - 1)
    def _():
        out_ref[...] = acc_ref[...]                   # shard's partial NLL sum


# ---------------------------------------------------------------------------
# Generation-aware sizing
# ---------------------------------------------------------------------------
def _tpu_generation() -> str:
    try:
        kind = jax.devices()[0].device_kind.lower()
    except Exception:
        return "unknown"
    if "v7" in kind or "7x" in kind:
        return "v7x"
    if "v6" in kind or "trillium" in kind:
        return "v6e"
    if "v5 lite" in kind or "v5e" in kind or "v5lite" in kind:
        return "v5e"
    return "unknown"


# generation -> (VMEM working-set budget for tile sizing, vmem_limit_bytes cap)
_GEN_VMEM = {
    "v5e": (40 << 20, 100 << 20),   # 128 MiB physical; raise past 16 MiB default
    "v6e": (48 << 20, 100 << 20),   # 128 MiB physical
    "v7x": (26 << 20, 44 << 20),    # only 64 MiB physical per TC
    "unknown": (24 << 20, 44 << 20),
}


def pallas_cross_entropy(logits: jax.Array, targets: jax.Array,
                         block_rows: int | None = None,
                         num_row_shards: int | None = None,
                         bf16_compute: bool = False) -> jax.Array:
    """CrossEntropyLoss(mean) as a tiled, pipelined Pallas TPU kernel.

    logits : (N, C) float (f32 or bf16 — kept in native dtype through the DMA)
    targets: (N,)  integer class indices
    returns: scalar float32
    """
    n, c = logits.shape
    targets_2d = targets.astype(jnp.int32).reshape(n, 1)

    itemsize = jnp.dtype(logits.dtype).itemsize
    # sublane packing: 8 rows for 32-bit, 16 for bf16, 32 for 8-bit dtypes
    align = max(8, 32 // max(itemsize, 1))

    gen = _tpu_generation()
    budget, vmem_cap = _GEN_VMEM[gen]

    # Per-row VMEM footprint model (bytes per logit row per pipeline step):
    #   2x double-buffered logits block, 2x double-buffered targets block
    #   ((tile_n,1) int32 pads to (tile_n,128)), ~4 f32 block temporaries,
    #   ~8 lane-padded (tile_n,128) f32 row-stat temporaries.
    k_block_temps = 4
    k_row_temps = 8
    per_row_bytes = (2 * c * itemsize
                     + 2 * 128 * 4
                     + k_block_temps * c * 4
                     + k_row_temps * 128 * 4)

    if block_rows is None:
        tile_n = budget // max(per_row_bytes, 1)
        tile_n = min(tile_n, 8192)
    else:
        tile_n = block_rows
    tile_n = max(align, (tile_n // align) * align)
    n_padded = ((n + align - 1) // align) * align
    tile_n = min(tile_n, n_padded)

    num_tiles = pl.cdiv(n, tile_n)

    # v7x has 2 TensorCores per chip: split the row loop across them via a
    # leading "parallel" grid axis with per-shard partial sums.
    if num_row_shards is None:
        num_row_shards = 2 if (gen == "v7x" and num_tiles >= 4) else 1
    num_row_shards = int(max(1, min(num_row_shards, num_tiles)))
    tiles_per_shard = pl.cdiv(num_tiles, num_row_shards)

    footprint = tile_n * per_row_bytes + (2 << 20)
    vmem_limit = int(min(vmem_cap, max(32 << 20, footprint + footprint // 4)))

    kernel = functools.partial(_ce_tile_kernel, total_n=n, tile_n=tile_n,
                               tiles_per_shard=tiles_per_shard,
                               bf16_compute=bf16_compute)

    last_tile = num_tiles - 1

    def row_block_map(s, t):
        # clamp so over-allocated shard tiles never DMA out of bounds;
        # the in-kernel row mask zeroes their contribution.
        return (jnp.minimum(s * tiles_per_shard + t, last_tile), 0)

    cost = pl.CostEstimate(
        flops=6 * n * c,
        transcendentals=n * c + n,
        bytes_accessed=n * c * itemsize + n * 4 + num_row_shards * 4,
    )

    partial_sums = pl.pallas_call(
        kernel,
        out_shape=jax.ShapeDtypeStruct((num_row_shards, 1), jnp.float32),
        grid_spec=pltpu.PrefetchScalarGridSpec(
            num_scalar_prefetch=0,
            grid=(num_row_shards, tiles_per_shard),
            in_specs=[
                pl.BlockSpec((tile_n, c), row_block_map),
                pl.BlockSpec((tile_n, 1), row_block_map),
            ],
            out_specs=pl.BlockSpec((1, 1), lambda s, t: (s, 0)),
            scratch_shapes=[pltpu.VMEM((1, 1), jnp.float32)],
        ),
        compiler_params=pltpu.CompilerParams(
            dimension_semantics=("parallel", "arbitrary"),
            vmem_limit_bytes=vmem_limit,
        ),
        cost_estimate=cost,
    )(logits, targets_2d)

    return jnp.sum(partial_sums) / jnp.float32(n)


# ---------------------------------------------------------------------------
# Container (Python glue, same semantics as the PyTorch module)
# ---------------------------------------------------------------------------
class PallasCrossEntropyLoss:
    """Stand-in for torch.nn.CrossEntropyLoss backed by the Pallas kernel."""

    def __init__(self, bf16_compute: bool = False) -> None:
        self.bf16_compute = bf16_compute

    def __call__(self, prediction: jax.Array, target_long: jax.Array) -> jax.Array:
        return pallas_cross_entropy(prediction, target_long,
                                    bf16_compute=self.bf16_compute)


class BaseLossContainer:
    """JAX/Pallas port of BaseLossContainer.

    forward(prediction, batch) -> Dict[str, jnp.ndarray] with one entry per
    registered loss ('<stage>/<name>') plus the summed '<stage>/loss'.
    """

    def __init__(self, stage: str) -> None:
        self.stage = stage
        self.losses = []  # list of (name, prediction_key, batch_key, loss_fn)

    def add_loss(self, name: str, prediction_key: str, batch_key: str, loss) -> None:
        self.losses.append((name, prediction_key, batch_key, loss))

    def forward(self, prediction, batch):
        loss_dict = {}
        for name, prediction_key, batch_key, loss in self.losses:
            # .long() in PyTorch -> cast targets to integer dtype here
            target = batch[batch_key].astype(jnp.int32)
            loss_dict[f"{self.stage}/{name}"] = loss(prediction[prediction_key], target)
        loss_dict[f"{self.stage}/loss"] = sum(loss_dict.values())
        return loss_dict

    __call__ = forward


# ---------------------------------------------------------------------------
# Self-test
# ---------------------------------------------------------------------------
if __name__ == "__main__":
    key = jax.random.PRNGKey(0)
    k1, k2, k3, k4, k5, k6, k7, k8 = jax.random.split(key, 8)

    # Small deterministic example shapes: batch=8 examples, 32 classes.
    N, C = 8, 32
    pred_main = jax.random.normal(k1, (N, C), dtype=jnp.float32)
    pred_aux = jax.random.normal(k2, (N, C), dtype=jnp.float32)
    tgt_main = jax.random.randint(k3, (N,), 0, C, dtype=jnp.int32)
    tgt_aux = jax.random.randint(k4, (N,), 0, C, dtype=jnp.int32)

    prediction = {"logits_main": pred_main, "logits_aux": pred_aux}
    batch = {"labels_main": tgt_main, "labels_aux": tgt_aux}

    container = BaseLossContainer(stage="train")
    container.add_loss("ce_main", "logits_main", "labels_main", PallasCrossEntropyLoss())
    container.add_loss("ce_aux", "logits_aux", "labels_aux", PallasCrossEntropyLoss())

    loss_dict = container(prediction, batch)
    jax.block_until_ready(loss_dict)

    # sanity check against pure-JAX reference
    def ref_ce(logits, targets):
        logp = jax.nn.log_softmax(logits.astype(jnp.float32), axis=-1)
        return -jnp.mean(logp[jnp.arange(logits.shape[0]), targets])

    ref_main = ref_ce(pred_main, tgt_main)
    ref_aux = ref_ce(pred_aux, tgt_aux)
    assert jnp.allclose(loss_dict["train/ce_main"], ref_main, atol=1e-5)
    assert jnp.allclose(loss_dict["train/ce_aux"], ref_aux, atol=1e-5)
    assert jnp.allclose(loss_dict["train/loss"], ref_main + ref_aux, atol=1e-5)

    # multi-tile grid + padded-final-tile masking path
    N2 = 20
    pred_big = jax.random.normal(k5, (N2, C), dtype=jnp.float32)
    tgt_big = jax.random.randint(k6, (N2,), 0, C, dtype=jnp.int32)
    ref_big = ref_ce(pred_big, tgt_big)
    tiled = pallas_cross_entropy(pred_big, tgt_big, block_rows=8)  # 3 tiles, last padded
    jax.block_until_ready(tiled)
    assert jnp.allclose(tiled, ref_big, atol=1e-5)

    # exercise the 2-shard (v7x two-TensorCore) row-split path on any chip
    # (runs sequentially on single-TC chips; same result either way)
    sharded = pallas_cross_entropy(pred_big, tgt_big, block_rows=8, num_row_shards=2)
    jax.block_until_ready(sharded)
    assert jnp.allclose(sharded, ref_big, atol=1e-5)

    # bf16 fast-path (opt-in): bf16 max/sub/exp, f32 accumulation
    N3, C3 = 64, 128
    pred_bf16 = jax.random.normal(k7, (N3, C3), dtype=jnp.float32).astype(jnp.bfloat16)
    tgt_bf16 = jax.random.randint(k8, (N3,), 0, C3, dtype=jnp.int32)
    out_bf16 = pallas_cross_entropy(pred_bf16, tgt_bf16, bf16_compute=True)
    jax.block_until_ready(out_bf16)
    ref_bf16 = ref_ce(pred_bf16.astype(jnp.float32), tgt_bf16)
    assert jnp.allclose(out_bf16, ref_bf16, atol=3e-2, rtol=3e-2)

    print("KERNEL_OK")
</pallas_src>

<mosaic_0001>
module attributes {stable_mosaic.version = 11 : i64} {
  func.func @_ce_tile_kernel(%arg0: i32, %arg1: i32, %arg2: memref<8x32xf32, #tpu.memory_space<vmem>>, %arg3: memref<8x1xi32, #tpu.memory_space<vmem>>, %arg4: memref<1x1xf32, #tpu.memory_space<vmem>>, %arg5: memref<1x1xf32, #tpu.memory_space<vmem>>) attributes {dimension_semantics = [#tpu.dimension_semantics<parallel>, #tpu.dimension_semantics<arbitrary>], iteration_bounds = array<i64: 1, 1>, scalar_prefetch = 0 : i64, scratch_operands = 1 : i64, tpu.core_type = #tpu.core_type<tc>, window_params = [{transform_indices = @transform_0, window_bounds = array<i64: 8, 32>}, {transform_indices = @transform_1, window_bounds = array<i64: 8, 1>}, {transform_indices = @transform_2, window_bounds = array<i64: 1, 1>}]} {
    %c0_i32 = arith.constant 0 : i32
    %0 = arith.cmpi eq, %arg1, %c0_i32 : i32
    %1 = arith.extui %0 : i1 to i32
    %c0_i32_0 = arith.constant 0 : i32
    %2 = arith.cmpi ne, %1, %c0_i32_0 : i32
    scf.if %2 {
      %cst_16 = arith.constant 0.000000e+00 : f32
      %44 = vector.broadcast %cst_16 : f32 to vector<1x1xf32>
      %c0_17 = arith.constant 0 : index
      %c0_18 = arith.constant 0 : index
      %45 = vector.load %arg5[%c0_17, %c0_18] : memref<1x1xf32, #tpu.memory_space<vmem>>, vector<1x1xf32>
      tpu.vector_store %arg5[%c0_17, %c0_18], %44 {strides = array<i32>} : memref<1x1xf32, #tpu.memory_space<vmem>>, vector<1x1xf32>,
    } else {
    }
    %c0 = arith.constant 0 : index
    %c0_1 = arith.constant 0 : index
    %3 = vector.load %arg2[%c0, %c0_1] : memref<8x32xf32, #tpu.memory_space<vmem>>, vector<8x32xf32>
    %c0_2 = arith.constant 0 : index
    %c0_3 = arith.constant 0 : index
    %4 = vector.load %arg3[%c0_2, %c0_3] : memref<8x1xi32, #tpu.memory_space<vmem>>, vector<8x1xi32>
    %5 = tpu.iota {dimensions = array<i32: 1>} : vector<1x32xi32>
    %6 = vector.broadcast %5 : vector<1x32xi32> to vector<8x32xi32>
    %7 = vector.broadcast %4 : vector<8x1xi32> to vector<8x32xi32>
    %8 = arith.cmpi eq, %6, %7 : vector<8x32xi32>
    %cst = arith.constant 0.000000e+00 : f32
    %9 = vector.broadcast %cst : f32 to vector<8x32xf32>
    %10 = arith.select %8, %3, %9 : vector<8x32xi1>, vector<8x32xf32>
    %cst_4 = arith.constant dense<0.000000e+00> : vector<8xf32>
    %11 = vector.multi_reduction <add>, %10, %cst_4 [1] : vector<8x32xf32> to vector<8xf32>
    %12 = vector.shape_cast %11 : vector<8xf32> to vector<8x1xf32>
    %cst_5 = arith.constant dense<0xFF800000> : vector<8xf32>
    %13 = vector.multi_reduction <maximumf>, %3, %cst_5 [1] : vector<8x32xf32> to vector<8xf32>
    %14 = vector.shape_cast %13 : vector<8xf32> to vector<8x1xf32>
    %15 = vector.broadcast %14 : vector<8x1xf32> to vector<8x32xf32>
    %16 = arith.subf %3, %15 : vector<8x32xf32>
    %17 = math.exp %16 : vector<8x32xf32>
    %cst_6 = arith.constant dense<0.000000e+00> : vector<8xf32>
    %18 = vector.multi_reduction <add>, %17, %cst_6 [1] : vector<8x32xf32> to vector<8xf32>
    %19 = vector.shape_cast %18 : vector<8xf32> to vector<8x1xf32>
    %20 = math.log %19 : vector<8x1xf32>
    %21 = arith.addf %14, %20 : vector<8x1xf32>
    %22 = arith.subf %21, %12 : vector<8x1xf32>
    %c1_i32 = arith.constant 1 : i32
    %23 = arith.muli %arg0, %c1_i32 : i32
    %24 = arith.addi %23, %arg1 : i32
    %25 = tpu.iota {dimensions = array<i32: 0>} : vector<8x1xi32>
    %c8_i32 = arith.constant 8 : i32
    %26 = arith.muli %24, %c8_i32 : i32
    %27 = vector.broadcast %26 : i32 to vector<8x1xi32>
    %28 = arith.addi %25, %27 : vector<8x1xi32>
    %c8_i32_7 = arith.constant 8 : i32
    %29 = vector.broadcast %c8_i32_7 : i32 to vector<8x1xi32>
    %30 = arith.cmpi slt, %28, %29 : vector<8x1xi32>
    %cst_8 = arith.constant 0.000000e+00 : f32
    %31 = vector.broadcast %cst_8 : f32 to vector<8x1xf32>
    %32 = arith.select %30, %22, %31 : vector<8x1xi1>, vector<8x1xf32>
    %c0_9 = arith.constant 0 : index
    %c0_10 = arith.constant 0 : index
    %33 = vector.load %arg5[%c0_9, %c0_10] : memref<1x1xf32, #tpu.memory_space<vmem>>, vector<1x1xf32>
    %34 = vector.shape_cast %32 : vector<8x1xf32> to vector<1x8x1xf32>
    %cst_11 = arith.constant dense<0.000000e+00> : vector<1xf32>
    %35 = vector.multi_reduction <add>, %34, %cst_11 [1, 2] : vector<1x8x1xf32> to vector<1xf32>
    %36 = vector.shape_cast %35 : vector<1xf32> to vector<1x1x1xf32>
    %37 = vector.extract %36[0, 0, 0] : f32 from vector<1x1x1xf32>
    %38 = vector.broadcast %37 : f32 to vector<1x1xf32>
    %39 = arith.addf %33, %38 : vector<1x1xf32>
    %c0_12 = arith.constant 0 : index
    %c0_13 = arith.constant 0 : index
    %40 = vector.load %arg5[%c0_12, %c0_13] : memref<1x1xf32, #tpu.memory_space<vmem>>, vector<1x1xf32>
    tpu.vector_store %arg5[%c0_12, %c0_13], %39 {strides = array<i32>} : memref<1x1xf32, #tpu.memory_space<vmem>>, vector<1x1xf32>,
    %c0_i32_14 = arith.constant 0 : i32
    %41 = arith.cmpi eq, %arg1, %c0_i32_14 : i32
    %42 = arith.extui %41 : i1 to i32
    %c0_i32_15 = arith.constant 0 : i32
    %43 = arith.cmpi ne, %42, %c0_i32_15 : i32
    scf.if %43 {
      %c0_16 = arith.constant 0 : index
      %c0_17 = arith.constant 0 : index
      %44 = vector.load %arg5[%c0_16, %c0_17] : memref<1x1xf32, #tpu.memory_space<vmem>>, vector<1x1xf32>
      %c0_18 = arith.constant 0 : index
      %c0_19 = arith.constant 0 : index
      %45 = vector.load %arg4[%c0_18, %c0_19] : memref<1x1xf32, #tpu.memory_space<vmem>>, vector<1x1xf32>
      tpu.vector_store %arg4[%c0_18, %c0_19], %44 {strides = array<i32>} : memref<1x1xf32, #tpu.memory_space<vmem>>, vector<1x1xf32>,
    } else {
    }
    return
  }
  func.func @transform_0(%arg0: i32, %arg1: i32) -> (i32, i32) {
    %c1_i32 = arith.constant 1 : i32
    %0 = arith.muli %arg0, %c1_i32 : i32
    %1 = arith.addi %0, %arg1 : i32
    %c0_i32 = arith.constant 0 : i32
    %2 = arith.minsi %1, %c0_i32 : i32
    %c0_i32_0 = arith.constant 0 : i32
    %c0_i32_1 = arith.constant 0 : i32
    return %2, %c0_i32_0 : i32, i32
  }
  func.func @transform_1(%arg0: i32, %arg1: i32) -> (i32, i32) {
    %c1_i32 = arith.constant 1 : i32
    %0 = arith.muli %arg0, %c1_i32 : i32
    %1 = arith.addi %0, %arg1 : i32
    %c0_i32 = arith.constant 0 : i32
    %2 = arith.minsi %1, %c0_i32 : i32
    %c0_i32_0 = arith.constant 0 : i32
    %c0_i32_1 = arith.constant 0 : i32
    return %2, %c0_i32_0 : i32, i32
  }
  func.func @transform_2(%arg0: i32, %arg1: i32) -> (i32, i32) {
    %c0_i32 = arith.constant 0 : i32
    %c0_i32_0 = arith.constant 0 : i32
    return %arg0, %c0_i32 : i32, i32
  }
}

</mosaic_0001>

<bundles_post_ra>
// kernel: tpu_custom_call.1
= control target key start
LH: loop header
LB: loop body
LE: loop exit
PB: predicated region body
PF: predicated region fallthrough
CT: control target
= control target key end

     0   :  { %vm81_vm0 = vcmask 261120   ;;  %s218_s0 = inlined_call_operand.vmem [shape: f32[8,32], index: 0, kind: input, shape index: {}]   ;;  %s219_s1 = inlined_call_operand.vmem [shape: s32[8,1], index: 1, kind: input, shape index: {}]   ;;  %s220_s2 = inlined_call_operand.hbm [shape: f32[1,1], index: 2, kind: output, shape index: {}]  }
   0x1   :  { %v72_v0 = vld [vmem:[%s218_s0] sm:$0xff] }
   0x2   :  { %7 = vsyncpa [#allocation4], 0  ;;  %v85_v1 = vsel %vm81_vm0, %v72_v0, -inf  ;;  %v185_v2 = vmov 0   ;;  %v73_v3 = vld [vmem:[%s219_s1] sm:$0xff]  ;;  %v74_v7 = vlaneseq  ;;  %vm107_vm2 = vcmask 7168  }
   0x3   :  { %158 = vset.pattern.permute.xlu0 %v185_v2  ;;  %vm70_vm3 = vcmask 0   ;;  %v186_v21 = vmov 0.0   ;;  %s187_s1 = smov [#allocation3]  }
   0x4   :  { %86 = vmax.xlane.f32.xlu0 %v85_v1  ;;  %v75_v8 = vand.u32 127, %v74_v7  ;;  %71 = vst.msk [vmem:[#allocation2] sm:$0x1] %vm70_vm3, %v186_v21  ;;  %s133_s13 = sshll.u32 %s187_s1, 4  ;;  %s134_s13 = int_to_ptr.vmem [resolvable:$true] %s133_s13 }
   0x5   :  { %s163_s14 = scalar_lea.vmem %s134_s13, 16  ;;  %s167_s15 = scalar_lea.vmem %s134_s13, 32 }
   0x6   :  { %p164_p0 = scmp.ne.s32.totalorder %s134_s13, %s163_s14  ;;  %p168_p1 = scmp.lt.s32.totalorder %s134_s13, %s134_s13 }
   0x7   :  { %p169_p2 = scmp.lt.s32.totalorder %s167_s15, %s163_s14 }
   0x9   :  { %p170_p3 = por %p169_p2, %p168_p1 }
   0xb   :  { %v106_v29 = vld [vmem:[#allocation2] sm:$0x1]  ;;  %p171_p4 = pnand %p170_p3, %p164_p0 }
  0x1a   :  { %77 = vperm.xlu0 %158, %v73_v3  }
  0x8d   :  { %v87_v4 = vpop.xlane.xlu0 %86 }
  0x8e   :  { %v88_v5 = vsub.f32 %v72_v0, %v87_v4 }
  0x90   :  { %v89_v6 = vmul.f32 1.442695, %v88_v5 }
  0x92   :  { %159 = vpow2.f32 %v89_v6 }
  0x95   :  { %v78_v9 = vpop.permute.xlu0 %77 }
  0x96   :  { %vm79_vm1 = vcmp.eq.s32.totalorder %v75_v8, %v78_v9 }
  0x97   :  { %v80_v11 = vsel %vm79_vm1, %v72_v0, 0.0 }
  0x98   :  { %v82_v13 = vsel %vm81_vm0, %v80_v11, 0.0 }
  0x9f   :  { %v160_v10 = vpop.eup %159 }
  0xa0   :  { %v91_v12 = vsel %vm81_vm0, %v160_v10, 0.0 }
  0xa1   :  { %92 = vadd.xlane.f32.xlu1 %v91_v12 }
  0xa5   :  { %83 = vadd.xlane.f32.xlu1 %v82_v13 }
 0x12a   :  { %v93_v14 = vpop.xlane.xlu1 %92 }
 0x12b   :  { %161 = vlog2.f32 %v93_v14 }
 0x12e   :  { %v84_v17 = vpop.xlane.xlu1 %83 }
 0x138   :  { %v162_v15 = vpop.eup %161 }
 0x139   :  { %v95_v16 = vmul.f32 0.6931472, %v162_v15 }
 0x13b   :  { %v96_v18 = vadd.f32 %v95_v16, %v87_v4 }
 0x13d   :  { %v97_v19 = vsub.f32 %v96_v18, %v84_v17 }
 0x13f   :  { %v108_v20 = vsel %vm107_vm2, %v97_v19, 0.0 }
 0x140   :  { %109 = vadd.xlane.f32.xlu1 %v108_v20 }
 0x1c9   :  { %v110_v22 = vpop.xlane.xlu1 %109 }
 0x1ca   :  { %v111_v23 = vrot.slane %v110_v22, 4 }
 0x1cc   :  { %v112_v24 = vadd.f32 %v111_v23, %v110_v22 }
 0x1ce   :  { %v113_v25 = vrot.slane %v112_v24, 2 }
 0x1d0   :  { %v114_v26 = vadd.f32 %v113_v25, %v112_v24 }
 0x1d2   :  { %v115_v27 = vrot.slane %v114_v26, 1 }
 0x1d4   :  { %v116_v28 = vadd.f32 %v115_v27, %v114_v26 }
 0x1d6   :  { %153 = vpush %v116_v28 }
 0x207   :  { %s154_s0 = spop %153 }
 0x208   :  { %v118_v30 = vstv %s154_s0 }
 0x209   :  { %v119_v31 = vadd.f32 %v118_v30, %v106_v29 }
 0x20b   :  { %121 = vst.msk [vmem:[#allocation2] sm:$0x1] %vm70_vm3, %v119_v31 }
 0x212   :  { %v125_v32 = vld [vmem:[#allocation2] sm:$0x1] }
 0x213   :  { %126 = vst.msk [vmem:[#allocation3] sm:$0x1] %vm70_vm3, %v125_v32 }
 0x214   :  { %174 = shalt.err (!%p171_p4)
}
 0x215   :  { %136 = dma.vmem_to_hbm [thread:$0]  %s134_s13, 16, %s220_s2, [#allocation4]  }
 0x216   :  { %183 = dma.done.wait [#allocation4], 16  }
 0x217   :  { %184 = vsyncadd [#allocation4], 4294967280 }
 0x218   :  { %140 = vsyncpa [#allocation4], 1 }

</bundles_post_ra>
